<compile_context>
chip_gen: v5e
topology: v5e:2x2
jax: 0.10.0
libtpu: 0.0.40
codegen_flags: <defaults>
</compile_context>

<pallas_src>
import functools

import jax
import jax.numpy as jnp
from jax import lax
from jax.experimental import pallas as pl
from jax.experimental.pallas import tpu as pltpu


def _round_up(n, m):
    return ((n + m - 1) // m) * m


def _cross_attn_kernel(x_ref, y_ref, wq_ref, wkv_ref, wp_ref,
                       bq_ref, bkv_ref, bp_ref, temp_ref, bmask_ref, lmask_ref,
                       out_ref, *scratch, num_heads, hw_valid, fuse_heads):
    """One batch element: projections + per-head channel attention + project_out."""
    dim, hw = x_ref.shape
    ch = dim // num_heads

    x = x_ref[...]                                   # (dim, hw)   bf16
    y = y_ref[...]                                   # (dim, hw)   bf16

    # 1x1 conv == per-pixel linear: (out, in) @ (in, hw) + bias.
    # bf16 MXU operands, f32 accumulation. Wk/Wv are stacked so k and v come
    # from one taller matmul.
    q = jnp.dot(wq_ref[...], x, preferred_element_type=jnp.float32) + bq_ref[...]
    kv = jnp.dot(wkv_ref[...], y, preferred_element_type=jnp.float32) + bkv_ref[...]
    k = kv[:dim, :]
    v = kv[dim:, :].astype(jnp.bfloat16)             # v needs no masking / norm

    if hw_valid < hw:
        # Lane padding picked up the bias — zero it with a precomputed {0,1}
        # mask so the L2 norms and the q·kᵀ contraction ignore padded pixels.
        lm = lmask_ref[...]                          # (1, hw) f32
        q = q * lm
        k = k * lm

    # F.normalize(dim=-1): x * rsqrt(max(||x||², 1e-24)).  The per-head
    # temperature (constant within a head) is folded into q as a per-row scale:
    # (temp·qn) @ knᵀ == temp · (qn @ knᵀ).
    qn = q * lax.rsqrt(jnp.maximum(jnp.sum(q * q, axis=-1, keepdims=True), 1e-24))
    kn = k * lax.rsqrt(jnp.maximum(jnp.sum(k * k, axis=-1, keepdims=True), 1e-24))
    qn = (qn * temp_ref[...]).astype(jnp.bfloat16)
    kn = kn.astype(jnp.bfloat16)

    if fuse_heads:
        # Fused path (small dim): one lane-dense (dim, dim) gram with an
        # additive block-diagonal mask (-1e30 off-block) replaces num_heads
        # tiny (ch, ch) matmuls / softmaxes that waste MXU/VPU/EUP lanes.
        s = lax.dot_general(qn, kn, (((1,), (1,)), ((), ())),
                            preferred_element_type=jnp.float32)      # (dim, dim)
        s = s + bmask_ref[...]
        p = jnp.exp(s - jnp.max(s, axis=-1, keepdims=True))
        attn = (p * pl.reciprocal(jnp.sum(p, axis=-1, keepdims=True),
                                  approx=True)).astype(jnp.bfloat16)
        o = jnp.dot(attn, v,
                    preferred_element_type=jnp.float32).astype(jnp.bfloat16)
    else:
        # Per-head path (large dim): avoids the num_heads× extra gram FLOPs.
        o_scratch, = scratch                                          # bf16
        for hd in range(num_heads):
            lo = hd * ch
            qh = qn[lo:lo + ch, :]
            kh = kn[lo:lo + ch, :]
            vh = v[lo:lo + ch, :]
            a = lax.dot_general(qh, kh, (((1,), (1,)), ((), ())),
                                preferred_element_type=jnp.float32)
            a = jnp.exp(a - jnp.max(a, axis=-1, keepdims=True))
            a = (a * pl.reciprocal(jnp.sum(a, axis=-1, keepdims=True),
                                   approx=True)).astype(jnp.bfloat16)
            o_scratch[pl.ds(lo, ch), :] = jnp.dot(
                a, vh, preferred_element_type=jnp.float32).astype(jnp.bfloat16)
        o = o_scratch[...]

    # Fused project_out: (dim, dim) @ (dim, hw) + bias, stored as bf16.
    out_ref[...] = (jnp.dot(wp_ref[...], o, preferred_element_type=jnp.float32)
                    + bp_ref[...]).astype(out_ref.dtype)


@functools.partial(jax.jit, static_argnames=("num_heads", "fuse_heads"))
def cross_attn_forward(x, y, params, num_heads, fuse_heads=None):
    """x, y: NCHW float32 arrays of identical shape."""
    assert x.shape == y.shape, "image / event feature maps must match"
    b, c, h, w = x.shape
    dim = c
    hw = h * w
    assert dim % num_heads == 0
    ch = dim // num_heads
    assert dim % 8 == 0, "dim must be a multiple of 8 (sublane tiling)"

    if fuse_heads is None:
        fuse_heads = dim <= 256        # block-diag fusion pays off for small dim
    if not fuse_heads:
        assert ch % 8 == 0, "per-head path needs channels-per-head % 8 == 0"

    hw_pad = _round_up(hw, 128)        # lane-dense blocks and stores

    # Real VMEM budget: pipelined (double-buffered) blocks + the f32/bf16
    # values the compiler keeps live inside one step; tied to vmem_limit_bytes.
    bytes_blocks = (2 * (2 * dim * hw_pad * 2)       # x, y (bf16)
                    + 2 * (dim * hw_pad * 2)         # out (bf16)
                    + 2 * (4 * dim * dim * 2)        # Wq + Wkv + Wp (bf16)
                    + 2 * (dim * dim * 4)            # block-diag mask (f32)
                    + 2 * (6 * dim * 128 * 4))       # lane-padded bias/temp/mask vecs
    bytes_live = 22 * dim * hw_pad                   # f32 q/kv + bf16 qn/kn/v/o
    bytes_scratch = 0 if fuse_heads else dim * hw_pad * 2
    vmem_bytes = bytes_blocks + bytes_live + bytes_scratch
    assert vmem_bytes < 48 * 1024 * 1024, (
        "per-batch block too large for VMEM — needs the hw-tile two-phase path")
    vmem_limit = int(min(max(vmem_bytes * 5 // 4, 8 << 20), 64 << 20))
    # TODO(synk): for Restormer-scale hw (>=16K) on v7x (64 MiB VMEM) add an
    # hw-tile 'arbitrary' grid axis (phase 1: accumulate L2 norms + q·kᵀ over
    # hw tiles; phase 2: softmax·v + project_out per hw tile); that tiled axis
    # also provides a second parallel axis so both v7x TensorCores stay busy
    # when batch == 1.
    # TODO(synk): weight/bias/mask blocks are grid-invariant; verify Mosaic
    # collapses their double-buffering (else pl.Buffered(1) on those specs).

    xf = x.reshape(b, dim, hw)
    yf = y.reshape(b, dim, hw)
    if hw_pad != hw:
        xf = jnp.pad(xf, ((0, 0), (0, 0), (0, hw_pad - hw)))
        yf = jnp.pad(yf, ((0, 0), (0, 0), (0, hw_pad - hw)))
    xf = xf.astype(jnp.bfloat16)
    yf = yf.astype(jnp.bfloat16)

    wq = params["wq"].astype(jnp.bfloat16)
    wkv = jnp.concatenate([params["wk"], params["wv"]], axis=0).astype(jnp.bfloat16)
    wp = params["wp"].astype(jnp.bfloat16)
    bq = params["bq"]
    bkv = jnp.concatenate([params["bk"], params["bv"]], axis=0)
    bp = params["bp"]

    # Per-row temperature and additive block-diagonal mask, precomputed once.
    temp_row = jnp.repeat(params["temp"], ch)[:, None].astype(jnp.float32)
    head_id = jnp.arange(dim, dtype=jnp.int32) // ch
    bmask = jnp.where(head_id[:, None] == head_id[None, :],
                      0.0, -1e30).astype(jnp.float32)
    lmask = (jnp.arange(hw_pad) < hw).astype(jnp.float32)[None, :]

    kernel = functools.partial(_cross_attn_kernel, num_heads=num_heads,
                               hw_valid=hw, fuse_heads=fuse_heads)

    const2d = lambda bi: (0, 0)
    flops = int(12 * b * dim * dim * hw_pad)              # 6 matmuls of dim·dim·hw
    transcendentals = int(b * dim * (dim + 2))            # exp + rsqrt
    bytes_accessed = int(b * 6 * dim * hw_pad + 16 * dim * dim)

    out = pl.pallas_call(
        kernel,
        out_shape=jax.ShapeDtypeStruct((b, dim, hw_pad), jnp.bfloat16),
        grid=(b,),
        in_specs=[
            pl.BlockSpec((None, dim, hw_pad), lambda bi: (bi, 0, 0)),   # x
            pl.BlockSpec((None, dim, hw_pad), lambda bi: (bi, 0, 0)),   # y
            pl.BlockSpec((dim, dim), const2d),                          # Wq
            pl.BlockSpec((2 * dim, dim), const2d),                      # Wkv (stacked)
            pl.BlockSpec((dim, dim), const2d),                          # Wp
            pl.BlockSpec((dim, 1), const2d),                            # bq
            pl.BlockSpec((2 * dim, 1), const2d),                        # bkv (stacked)
            pl.BlockSpec((dim, 1), const2d),                            # bp
            pl.BlockSpec((dim, 1), const2d),                            # temperature/row
            pl.BlockSpec((dim, dim), const2d),                          # block-diag mask
            pl.BlockSpec((1, hw_pad), const2d),                         # lane validity
        ],
        out_specs=pl.BlockSpec((None, dim, hw_pad), lambda bi: (bi, 0, 0)),
        scratch_shapes=([] if fuse_heads
                        else [pltpu.VMEM((dim, hw_pad), jnp.bfloat16)]),
        compiler_params=pltpu.CompilerParams(
            dimension_semantics=("parallel",),
            vmem_limit_bytes=vmem_limit),
        cost_estimate=pl.CostEstimate(flops=flops,
                                      transcendentals=transcendentals,
                                      bytes_accessed=bytes_accessed),
    )(xf, yf, wq, wkv, wp, bq, bkv, bp, temp_row, bmask, lmask)

    out = out[:, :, :hw].astype(jnp.float32)
    return out.reshape(b, dim, h, w)


def reference_forward(x, y, params, num_heads):
    """Pure-JAX f32 reference matching the PyTorch forward semantics."""
    b, c, h, w = x.shape
    hw = h * w
    ch = c // num_heads

    def conv1x1(inp, w_, b_):
        return jnp.einsum("oi,bip->bop", w_, inp) + b_[None]

    xf = x.reshape(b, c, hw)
    yf = y.reshape(b, c, hw)
    q = conv1x1(xf, params["wq"], params["bq"]).reshape(b, num_heads, ch, hw)
    k = conv1x1(yf, params["wk"], params["bk"]).reshape(b, num_heads, ch, hw)
    v = conv1x1(yf, params["wv"], params["bv"]).reshape(b, num_heads, ch, hw)
    qn = q / jnp.maximum(jnp.linalg.norm(q, axis=-1, keepdims=True), 1e-12)
    kn = k / jnp.maximum(jnp.linalg.norm(k, axis=-1, keepdims=True), 1e-12)
    attn = jnp.einsum("bhcp,bhdp->bhcd", qn, kn) * params["temp"][None, :, None, None]
    attn = jax.nn.softmax(attn, axis=-1)
    o = jnp.einsum("bhcd,bhdp->bhcp", attn, v).reshape(b, c, hw)
    o = conv1x1(o, params["wp"], params["bp"])
    return o.reshape(b, c, h, w)


def init_params(key, dim, num_heads):
    ks = jax.random.split(key, 8)
    scale = 1.0 / jnp.sqrt(dim)
    return {
        "wq": jax.random.uniform(ks[0], (dim, dim), jnp.float32, -scale, scale),
        "wk": jax.random.uniform(ks[1], (dim, dim), jnp.float32, -scale, scale),
        "wv": jax.random.uniform(ks[2], (dim, dim), jnp.float32, -scale, scale),
        "wp": jax.random.uniform(ks[3], (dim, dim), jnp.float32, -scale, scale),
        "bq": jax.random.uniform(ks[4], (dim, 1), jnp.float32, -scale, scale),
        "bk": jax.random.uniform(ks[5], (dim, 1), jnp.float32, -scale, scale),
        "bv": jax.random.uniform(ks[6], (dim, 1), jnp.float32, -scale, scale),
        "bp": jax.random.uniform(ks[7], (dim, 1), jnp.float32, -scale, scale),
        # nn.Parameter(torch.ones(num_heads,1,1)); perturbed deterministically
        # so the temperature scaling is actually exercised.
        "temp": 1.0 + 0.1 * jnp.arange(num_heads, dtype=jnp.float32),
    }


if __name__ == "__main__":
    B, DIM, NUM_HEADS = 2, 32, 4     # ch-per-head = 8

    key = jax.random.PRNGKey(0)
    kx, ky, kp, kx2, ky2 = jax.random.split(key, 5)
    params = init_params(kp, DIM, NUM_HEADS)

    # 1) lane-dense spatial (16x16 -> hw = 256), fused block-diagonal path.
    x = jax.random.normal(kx, (B, DIM, 16, 16), jnp.float32)
    y = jax.random.normal(ky, (B, DIM, 16, 16), jnp.float32)
    out = jax.block_until_ready(cross_attn_forward(x, y, params, NUM_HEADS))
    ref = reference_forward(x, y, params, NUM_HEADS)
    assert out.shape == (B, DIM, 16, 16)
    assert jnp.allclose(out, ref, rtol=3e-2, atol=3e-2), "fused path mismatch"

    # 2) non-multiple-of-128 spatial (15x17 -> hw = 255, padded to 256):
    #    exercises the lane-validity mask.
    x2 = jax.random.normal(kx2, (B, DIM, 15, 17), jnp.float32)
    y2 = jax.random.normal(ky2, (B, DIM, 15, 17), jnp.float32)
    out2 = jax.block_until_ready(cross_attn_forward(x2, y2, params, NUM_HEADS))
    ref2 = reference_forward(x2, y2, params, NUM_HEADS)
    assert jnp.allclose(out2, ref2, rtol=3e-2, atol=3e-2), "padded-hw mismatch"

    # 3) force the per-head (large-dim) path to validate it too.
    out3 = jax.block_until_ready(
        cross_attn_forward(x, y, params, NUM_HEADS, fuse_heads=False))
    assert jnp.allclose(out3, ref, rtol=3e-2, atol=3e-2), "per-head path mismatch"

    print("KERNEL_OK")
</pallas_src>

<mosaic_0001>
module attributes {stable_mosaic.version = 11 : i64} {
  func.func @_cross_attn_kernel(%arg0: i32, %arg1: memref<1x32x256xbf16, #tpu.memory_space<vmem>>, %arg2: memref<1x32x256xbf16, #tpu.memory_space<vmem>>, %arg3: memref<32x32xbf16, #tpu.memory_space<vmem>>, %arg4: memref<64x32xbf16, #tpu.memory_space<vmem>>, %arg5: memref<32x32xbf16, #tpu.memory_space<vmem>>, %arg6: memref<32x1xf32, #tpu.memory_space<vmem>>, %arg7: memref<64x1xf32, #tpu.memory_space<vmem>>, %arg8: memref<32x1xf32, #tpu.memory_space<vmem>>, %arg9: memref<32x1xf32, #tpu.memory_space<vmem>>, %arg10: memref<32x32xf32, #tpu.memory_space<vmem>>, %arg11: memref<1x256xf32, #tpu.memory_space<vmem>>, %arg12: memref<1x32x256xbf16, #tpu.memory_space<vmem>>) attributes {dimension_semantics = [#tpu.dimension_semantics<parallel>], iteration_bounds = array<i64: 2>, scalar_prefetch = 0 : i64, scratch_operands = 0 : i64, tpu.core_type = #tpu.core_type<tc>, window_params = [{transform_indices = @transform_0, window_bounds = array<i64: 1, 32, 256>}, {transform_indices = @transform_1, window_bounds = array<i64: 1, 32, 256>}, {pipeline_mode = #tpu.pipeline_mode<synchronous>, transform_indices = @transform_2, window_bounds = array<i64: 32, 32>}, {pipeline_mode = #tpu.pipeline_mode<synchronous>, transform_indices = @transform_3, window_bounds = array<i64: 64, 32>}, {pipeline_mode = #tpu.pipeline_mode<synchronous>, transform_indices = @transform_4, window_bounds = array<i64: 32, 32>}, {pipeline_mode = #tpu.pipeline_mode<synchronous>, transform_indices = @transform_5, window_bounds = array<i64: 32, 1>}, {pipeline_mode = #tpu.pipeline_mode<synchronous>, transform_indices = @transform_6, window_bounds = array<i64: 64, 1>}, {pipeline_mode = #tpu.pipeline_mode<synchronous>, transform_indices = @transform_7, window_bounds = array<i64: 32, 1>}, {pipeline_mode = #tpu.pipeline_mode<synchronous>, transform_indices = @transform_8, window_bounds = array<i64: 32, 1>}, {pipeline_mode = #tpu.pipeline_mode<synchronous>, transform_indices = @transform_9, window_bounds = array<i64: 32, 32>}, {pipeline_mode = #tpu.pipeline_mode<synchronous>, transform_indices = @transform_10, window_bounds = array<i64: 1, 256>}, {transform_indices = @transform_11, window_bounds = array<i64: 1, 32, 256>}]} {
    %c0 = arith.constant 0 : index
    %c0_0 = arith.constant 0 : index
    %c0_1 = arith.constant 0 : index
    %0 = vector.load %arg1[%c0, %c0_0, %c0_1] : memref<1x32x256xbf16, #tpu.memory_space<vmem>>, vector<1x32x256xbf16>
    %1 = vector.shape_cast %0 : vector<1x32x256xbf16> to vector<32x256xbf16>
    %c0_2 = arith.constant 0 : index
    %c0_3 = arith.constant 0 : index
    %c0_4 = arith.constant 0 : index
    %2 = vector.load %arg2[%c0_2, %c0_3, %c0_4] : memref<1x32x256xbf16, #tpu.memory_space<vmem>>, vector<1x32x256xbf16>
    %3 = vector.shape_cast %2 : vector<1x32x256xbf16> to vector<32x256xbf16>
    %c0_5 = arith.constant 0 : index
    %c0_6 = arith.constant 0 : index
    %4 = vector.load %arg3[%c0_5, %c0_6] : memref<32x32xbf16, #tpu.memory_space<vmem>>, vector<32x32xbf16>
    %cst = arith.constant dense<0.000000e+00> : vector<32x256xf32>
    %5 = tpu.matmul %4, %1, %cst {dimension_numbers = #tpu.dot_dimension_numbers<[1], [0], [0], [1], [0, 0, 1, 1], [], []>} : vector<32x32xbf16>, vector<32x256xbf16>, vector<32x256xf32> -> vector<32x256xf32>
    %c0_7 = arith.constant 0 : index
    %c0_8 = arith.constant 0 : index
    %6 = vector.load %arg6[%c0_7, %c0_8] : memref<32x1xf32, #tpu.memory_space<vmem>>, vector<32x1xf32>
    %7 = vector.broadcast %6 : vector<32x1xf32> to vector<32x256xf32>
    %8 = arith.addf %5, %7 : vector<32x256xf32>
    %c0_9 = arith.constant 0 : index
    %c0_10 = arith.constant 0 : index
    %9 = vector.load %arg4[%c0_9, %c0_10] : memref<64x32xbf16, #tpu.memory_space<vmem>>, vector<64x32xbf16>
    %cst_11 = arith.constant dense<0.000000e+00> : vector<64x256xf32>
    %10 = tpu.matmul %9, %3, %cst_11 {dimension_numbers = #tpu.dot_dimension_numbers<[1], [0], [0], [1], [0, 0, 1, 1], [], []>} : vector<64x32xbf16>, vector<32x256xbf16>, vector<64x256xf32> -> vector<64x256xf32>
    %c0_12 = arith.constant 0 : index
    %c0_13 = arith.constant 0 : index
    %11 = vector.load %arg7[%c0_12, %c0_13] : memref<64x1xf32, #tpu.memory_space<vmem>>, vector<64x1xf32>
    %12 = vector.broadcast %11 : vector<64x1xf32> to vector<64x256xf32>
    %13 = arith.addf %10, %12 : vector<64x256xf32>
    %14 = vector.extract_strided_slice %13 {offsets = [0, 0], sizes = [32, 256], strides = [1, 1]} : vector<64x256xf32> to vector<32x256xf32>
    %15 = vector.extract_strided_slice %13 {offsets = [32, 0], sizes = [32, 256], strides = [1, 1]} : vector<64x256xf32> to vector<32x256xf32>
    %16 = arith.truncf %15 : vector<32x256xf32> to vector<32x256xbf16>
    %17 = arith.mulf %8, %8 : vector<32x256xf32>
    %cst_14 = arith.constant dense<0.000000e+00> : vector<32xf32>
    %18 = vector.multi_reduction <add>, %17, %cst_14 [1] : vector<32x256xf32> to vector<32xf32>
    %19 = vector.shape_cast %18 : vector<32xf32> to vector<32x1xf32>
    %cst_15 = arith.constant 1.000000e-24 : f32
    %20 = vector.broadcast %cst_15 : f32 to vector<32x1xf32>
    %21 = arith.maximumf %19, %20 : vector<32x1xf32>
    %22 = math.rsqrt %21 : vector<32x1xf32>
    %23 = vector.broadcast %22 : vector<32x1xf32> to vector<32x256xf32>
    %24 = arith.mulf %8, %23 : vector<32x256xf32>
    %25 = arith.mulf %14, %14 : vector<32x256xf32>
    %cst_16 = arith.constant dense<0.000000e+00> : vector<32xf32>
    %26 = vector.multi_reduction <add>, %25, %cst_16 [1] : vector<32x256xf32> to vector<32xf32>
    %27 = vector.shape_cast %26 : vector<32xf32> to vector<32x1xf32>
    %cst_17 = arith.constant 1.000000e-24 : f32
    %28 = vector.broadcast %cst_17 : f32 to vector<32x1xf32>
    %29 = arith.maximumf %27, %28 : vector<32x1xf32>
    %30 = math.rsqrt %29 : vector<32x1xf32>
    %31 = vector.broadcast %30 : vector<32x1xf32> to vector<32x256xf32>
    %32 = arith.mulf %14, %31 : vector<32x256xf32>
    %c0_18 = arith.constant 0 : index
    %c0_19 = arith.constant 0 : index
    %33 = vector.load %arg9[%c0_18, %c0_19] : memref<32x1xf32, #tpu.memory_space<vmem>>, vector<32x1xf32>
    %34 = vector.broadcast %33 : vector<32x1xf32> to vector<32x256xf32>
    %35 = arith.mulf %24, %34 : vector<32x256xf32>
    %36 = arith.truncf %35 : vector<32x256xf32> to vector<32x256xbf16>
    %37 = arith.truncf %32 : vector<32x256xf32> to vector<32x256xbf16>
    %cst_20 = arith.constant dense<0.000000e+00> : vector<32x32xf32>
    %38 = tpu.matmul %36, %37, %cst_20 {dimension_numbers = #tpu.dot_dimension_numbers<[1], [1], [0], [0], [0, 0, 1, 0], [], []>} : vector<32x256xbf16>, vector<32x256xbf16>, vector<32x32xf32> -> vector<32x32xf32>
    %c0_21 = arith.constant 0 : index
    %c0_22 = arith.constant 0 : index
    %39 = vector.load %arg10[%c0_21, %c0_22] : memref<32x32xf32, #tpu.memory_space<vmem>>, vector<32x32xf32>
    %40 = arith.addf %38, %39 : vector<32x32xf32>
    %cst_23 = arith.constant dense<0xFF800000> : vector<32xf32>
    %41 = vector.multi_reduction <maximumf>, %40, %cst_23 [1] : vector<32x32xf32> to vector<32xf32>
    %42 = vector.shape_cast %41 : vector<32xf32> to vector<32x1xf32>
    %43 = vector.broadcast %42 : vector<32x1xf32> to vector<32x32xf32>
    %44 = arith.subf %40, %43 : vector<32x32xf32>
    %45 = math.exp %44 : vector<32x32xf32>
    %cst_24 = arith.constant dense<0.000000e+00> : vector<32xf32>
    %46 = vector.multi_reduction <add>, %45, %cst_24 [1] : vector<32x32xf32> to vector<32xf32>
    %47 = vector.shape_cast %46 : vector<32xf32> to vector<32x1xf32>
    %48 = tpu.reciprocal %47 {approx = true} : vector<32x1xf32> -> vector<32x1xf32>
    %49 = vector.broadcast %48 : vector<32x1xf32> to vector<32x32xf32>
    %50 = arith.mulf %45, %49 : vector<32x32xf32>
    %51 = arith.truncf %50 : vector<32x32xf32> to vector<32x32xbf16>
    %cst_25 = arith.constant dense<0.000000e+00> : vector<32x256xf32>
    %52 = tpu.matmul %51, %16, %cst_25 {dimension_numbers = #tpu.dot_dimension_numbers<[1], [0], [0], [1], [0, 0, 1, 1], [], []>} : vector<32x32xbf16>, vector<32x256xbf16>, vector<32x256xf32> -> vector<32x256xf32>
    %53 = arith.truncf %52 : vector<32x256xf32> to vector<32x256xbf16>
    %c0_26 = arith.constant 0 : index
    %c0_27 = arith.constant 0 : index
    %54 = vector.load %arg5[%c0_26, %c0_27] : memref<32x32xbf16, #tpu.memory_space<vmem>>, vector<32x32xbf16>
    %cst_28 = arith.constant dense<0.000000e+00> : vector<32x256xf32>
    %55 = tpu.matmul %54, %53, %cst_28 {dimension_numbers = #tpu.dot_dimension_numbers<[1], [0], [0], [1], [0, 0, 1, 1], [], []>} : vector<32x32xbf16>, vector<32x256xbf16>, vector<32x256xf32> -> vector<32x256xf32>
    %c0_29 = arith.constant 0 : index
    %c0_30 = arith.constant 0 : index
    %56 = vector.load %arg8[%c0_29, %c0_30] : memref<32x1xf32, #tpu.memory_space<vmem>>, vector<32x1xf32>
    %57 = vector.broadcast %56 : vector<32x1xf32> to vector<32x256xf32>
    %58 = arith.addf %55, %57 : vector<32x256xf32>
    %59 = arith.truncf %58 : vector<32x256xf32> to vector<32x256xbf16>
    %c0_31 = arith.constant 0 : index
    %c0_32 = arith.constant 0 : index
    %c0_33 = arith.constant 0 : index
    %60 = vector.load %arg12[%c0_31, %c0_32, %c0_33] : memref<1x32x256xbf16, #tpu.memory_space<vmem>>, vector<1x32x256xbf16>
    %61 = vector.shape_cast %60 : vector<1x32x256xbf16> to vector<32x256xbf16>
    %62 = vector.shape_cast %59 : vector<32x256xbf16> to vector<1x32x256xbf16>
    tpu.vector_store %arg12[%c0_31, %c0_32, %c0_33], %62 {strides = array<i32>} : memref<1x32x256xbf16, #tpu.memory_space<vmem>>, vector<1x32x256xbf16>,
    return
  }
  func.func @transform_0(%arg0: i32) -> (i32, i32, i32) {
    %c0_i32 = arith.constant 0 : i32
    %c0_i32_0 = arith.constant 0 : i32
    %c0_i32_1 = arith.constant 0 : i32
    return %arg0, %c0_i32, %c0_i32_0 : i32, i32, i32
  }
  func.func @transform_1(%arg0: i32) -> (i32, i32, i32) {
    %c0_i32 = arith.constant 0 : i32
    %c0_i32_0 = arith.constant 0 : i32
    %c0_i32_1 = arith.constant 0 : i32
    return %arg0, %c0_i32, %c0_i32_0 : i32, i32, i32
  }
  func.func @transform_2(%arg0: i32) -> (i32, i32) {
    %c0_i32 = arith.constant 0 : i32
    %c0_i32_0 = arith.constant 0 : i32
    %c0_i32_1 = arith.constant 0 : i32
    return %c0_i32, %c0_i32_0 : i32, i32
  }
  func.func @transform_3(%arg0: i32) -> (i32, i32) {
    %c0_i32 = arith.constant 0 : i32
    %c0_i32_0 = arith.constant 0 : i32
    %c0_i32_1 = arith.constant 0 : i32
    return %c0_i32, %c0_i32_0 : i32, i32
  }
  func.func @transform_4(%arg0: i32) -> (i32, i32) {
    %c0_i32 = arith.constant 0 : i32
    %c0_i32_0 = arith.constant 0 : i32
    %c0_i32_1 = arith.constant 0 : i32
    return %c0_i32, %c0_i32_0 : i32, i32
  }
  func.func @transform_5(%arg0: i32) -> (i32, i32) {
    %c0_i32 = arith.constant 0 : i32
    %c0_i32_0 = arith.constant 0 : i32
    %c0_i32_1 = arith.constant 0 : i32
    return %c0_i32, %c0_i32_0 : i32, i32
  }
  func.func @transform_6(%arg0: i32) -> (i32, i32) {
    %c0_i32 = arith.constant 0 : i32
    %c0_i32_0 = arith.constant 0 : i32
    %c0_i32_1 = arith.constant 0 : i32
    return %c0_i32, %c0_i32_0 : i32, i32
  }
  func.func @transform_7(%arg0: i32) -> (i32, i32) {
    %c0_i32 = arith.constant 0 : i32
    %c0_i32_0 = arith.constant 0 : i32
    %c0_i32_1 = arith.constant 0 : i32
    return %c0_i32, %c0_i32_0 : i32, i32
  }
  func.func @transform_8(%arg0: i32) -> (i32, i32) {
    %c0_i32 = arith.constant 0 : i32
    %c0_i32_0 = arith.constant 0 : i32
    %c0_i32_1 = arith.constant 0 : i32
    return %c0_i32, %c0_i32_0 : i32, i32
  }
  func.func @transform_9(%arg0: i32) -> (i32, i32) {
    %c0_i32 = arith.constant 0 : i32
    %c0_i32_0 = arith.constant 0 : i32
    %c0_i32_1 = arith.constant 0 : i32
    return %c0_i32, %c0_i32_0 : i32, i32
  }
  func.func @transform_10(%arg0: i32) -> (i32, i32) {
    %c0_i32 = arith.constant 0 : i32
    %c0_i32_0 = arith.constant 0 : i32
    %c0_i32_1 = arith.constant 0 : i32
    return %c0_i32, %c0_i32_0 : i32, i32
  }
  func.func @transform_11(%arg0: i32) -> (i32, i32, i32) {
    %c0_i32 = arith.constant 0 : i32
    %c0_i32_0 = arith.constant 0 : i32
    %c0_i32_1 = arith.constant 0 : i32
    return %arg0, %c0_i32, %c0_i32_0 : i32, i32, i32
  }
}

</mosaic_0001>

<bundles_post_ra>
// kernel: cross_attn_forward.1
= control target key start
LH: loop header
LB: loop body
LE: loop exit
PB: predicated region body
PF: predicated region fallthrough
CT: control target
= control target key end

     0   :  { %s1395_s17 = smov 0   ;;  %s1710_s0 = inlined_call_operand.vmem [shape: bf16[2,32,256], index: 0, kind: input, shape index: {}]   ;;  %s1711_s1 = inlined_call_operand.vmem [shape: bf16[2,32,256], index: 1, kind: input, shape index: {}]   ;;  %s1712_s2 = inlined_call_operand.vmem [shape: bf16[32,32], index: 2, kind: input, shape index: {}]   ;;  %s1713_s3 = inlined_call_operand.vmem [shape: bf16[64,32], index: 3, kind: input, shape index: {}]   ;;  %s1714_s4 = inlined_call_operand.vmem [shape: bf16[32,32], index: 4, kind: input, shape index: {}]   ;;  %s1715_s5 = inlined_call_operand.vmem [shape: f32[32,1], index: 5, kind: input, shape index: {}]   ;;  %s1716_s6 = inlined_call_operand.vmem [shape: f32[64,1], index: 6, kind: input, shape index: {}]   ;;  %s1717_s7 = inlined_call_operand.vmem [shape: f32[32,1], index: 7, kind: input, shape index: {}]   ;;  %s1718_s8 = inlined_call_operand.vmem [shape: f32[32,1], index: 8, kind: input, shape index: {}]   ;;  %s1719_s9 = inlined_call_operand.vmem [shape: f32[32,32], index: 9, kind: input, shape index: {}]   ;;  %s1720_s10 = inlined_call_operand.vmem [shape: f32[1,256], index: 10, kind: input, shape index: {}]   ;;  %s1721_s11 = inlined_call_operand.vmem [shape: bf16[2,32,256], index: 11, kind: output, shape index: {}]  }
   0x1 LB: > { %s1166_s18 = sadd.s32 4294967295, %s1332_s17   ;;  %p1170_p0 = scmp.ge.s32.totalorder %s1332_s17, 1  ;;  %s1332_s17 = sphi %s1395_s17, %s21_s17  }
   0x2   : > { %p347_p1 = scmp.lt.s32.totalorder %s1332_s17, 3 }
   0x4   : > { %p348_p2 = pnand %p1170_p0, %p347_p1 }
   0x5   : > { %p392_p3 = scmp.lt.s32.totalorder (!%p348_p2), %s1166_s18, 1 }
   0x6   : > { %351 = sbr.rel (%p348_p2) target bundleno = 1107 (0x453), region = 64 }
   0xb   : > { %v527_v0 = vld [vmem:[%s1716_s6] sm:$0xff]  ;;  %v1334_v1 = vmov 0   ;;  %v529_v2 = vld [vmem:[%s1716_s6 + $0x10] sm:$0xff]  ;;  %s1723_s18 = smov (!%p392_p3, %s1166_s18), 1  ;;  %v528_v7 = vld [vmem:[%s1716_s6 + $0x8] sm:$0xff]  ;;  %vm474_vm0 = vcmask 261120  }
   0xc   : > { %1292 = vset.pattern.permute.xlu1 %v1334_v1  ;;  %1291 = vset.pattern.permute.xlu0 %v1334_v1  ;;  %v420_v3 = vld [vmem:[%s1715_s5] sm:$0xff]  ;;  %s1412_s24 = sshll.u32 %s1723_s18, 5  ;;  %v530_v12 = vld [vmem:[%s1716_s6 + $0x18] sm:$0xff]  ;;  %v421_v13 = vld [vmem:[%s1715_s5 + $0x8] sm:$0xff] }
   0xd   : > { %537 = vperm.xlu1 %1292, %v527_v0   ;;  %547 = vperm.xlu0 %1291, %v529_v2   ;;  %s396_s27 = scalar_lea.vmem %s1710_s0, %s1412_s24  ;;  %s401_s30 = scalar_lea.vmem %s1711_s1, %s1412_s24  ;;  %v1274_v31 = vld [vmem:[%s1712_s2] sm:$0xff]  ;;  %v423_v33 = vld [vmem:[%s1715_s5 + $0x18] sm:$0xff]  ;;  %v422_v34 = vld [vmem:[%s1715_s5 + $0x10] sm:$0xff] }
   0xe   : > { %1293 = vset.pattern.permute.xlu2 %v1334_v1  ;;  %v1195_v4 = vld [vmem:[%s396_s27 + $0x10] sm:$0xf]  ;;  %v1269_v5 = vld [vmem:[%s396_s27 + $0x14] sm:$0xf0]  ;;  %v1268_v6 = vld [vmem:[%s396_s27 + $0x14] sm:$0xf]  ;;  %s406_s10 = scalar_lea.vmem %s1721_s11, %s1412_s24 }
   0xf   : > { %426 = vperm.xlu2 %1293, %v420_v3   ;;  %v1196_v8 = vor.u32 %v1269_v5, %v1195_v4  ;;  %v1197_v9 = vld [vmem:[%s396_s27 + $0x18] sm:$0xf0]  ;;  %v1231_v10 = vld [vmem:[%s401_s30 + $0x10] sm:$0xf]  ;;  %v1273_v11 = vld [vmem:[%s401_s30 + $0x14] sm:$0xf0] }
  0x10   : > { %v1200_v14 = vor.u32 %v1268_v6, %v1197_v9  ;;  %v1232_v15 = vor.u32 %v1273_v11, %v1231_v10  ;;  %v1272_v16 = vld [vmem:[%s401_s30 + $0x14] sm:$0xf]  ;;  %v1233_v17 = vld [vmem:[%s401_s30 + $0x18] sm:$0xf0]  ;;  %v1187_v18 = vld [vmem:[%s396_s27] sm:$0xf] }
  0x11   : > { %487 = vmatpush.bf16.msra.mxu0 %v1196_v8  ;;  %v1236_v19 = vor.u32 %v1272_v16, %v1233_v17  ;;  %v1267_v20 = vld [vmem:[%s396_s27 + $0x4] sm:$0xf0]  ;;  %v1266_v21 = vld [vmem:[%s396_s27 + $0x4] sm:$0xf]  ;;  %v1189_v22 = vld [vmem:[%s396_s27 + $0x8] sm:$0xf0] }
  0x12   : > { %506 = vmatpush.bf16.msra.mxu1 %v1200_v14  ;;  %633 = vmatpush.bf16.msra.mxu2 %v1232_v15  ;;  %v1188_v23 = vor.u32 %v1267_v20, %v1187_v18  ;;  %v1192_v24 = vor.u32 %v1266_v21, %v1189_v22  ;;  %v1223_v25 = vld [vmem:[%s401_s30] sm:$0xf]  ;;  %v1271_v26 = vld [vmem:[%s401_s30 + $0x4] sm:$0xf0]  ;;  %v1270_v27 = vld [vmem:[%s401_s30 + $0x4] sm:$0xf] }
  0x13   : > { %662 = vmatpush.bf16.msra.mxu3 %v1236_v19  ;;  %v1224_v28 = vor.u32 %v1271_v26, %v1223_v25  ;;  %v1225_v29 = vld [vmem:[%s401_s30 + $0x8] sm:$0xf0]  ;;  %v1276_v32 = vld [vmem:[%s1713_s3] sm:$0xff] }
  0x14   : > { %v1228_v30 = vor.u32 %v1270_v27, %v1225_v29  ;;  %v1275_v35 = vld [vmem:[%s1712_s2 + $0x8] sm:$0xff] }
  0x15   : > { %542 = vperm.xlu1 %1292, %v528_v7   ;;  %552 = vperm.xlu0 %1291, %v530_v12   ;;  %v1277_v36 = vld [vmem:[%s1713_s3 + $0x8] sm:$0xff] }
  0x16   : > { %488 = vmatpush.bf16.msra.mxu0 %v1188_v23  ;;  %507 = vmatpush.bf16.msra.mxu1 %v1192_v24 }
  0x17   : > { %431 = vperm.xlu2 %1293, %v421_v13   ;;  %634 = vmatpush.bf16.msra.mxu2 %v1224_v28 }
  0x18   : > { %663 = vmatpush.bf16.msra.mxu3 %v1228_v30 }
  0x19   : > { %1201 = vmatmul.msk.bf16.vlgmr.msra.gmra.mxu0 %vm474_vm0, %v1274_v31  ;;  %1203 = vmatmul.msk.bf16.vlgmr.msra.gmra.mxu1 %vm474_vm0, %v1274_v31 }
  0x1a   : > { %1237 = vmatmul.msk.bf16.vlgmr.msra.gmra.mxu2 %vm474_vm0, %v1276_v32 }
  0x1b   : > { %1241 = vmatmul.msk.bf16.vlgmr.msra.gmra.mxu3 %vm474_vm0, %v1276_v32 }
  0x1d   : > { %441 = vperm.xlu1 %1292, %v423_v33   ;;  %436 = vperm.xlu0 %1291, %v422_v34  }
  0x29   : > { %1202 = vmatmul.msk.bf16.gmra.mxu0 %vm474_vm0, %v1275_v35  ;;  %1204 = vmatmul.msk.bf16.gmra.mxu1 %vm474_vm0, %v1275_v35 }
  0x2a   : > { %1238 = vmatmul.msk.bf16.gmra.mxu2 %vm474_vm0, %v1277_v36 }
  0x2b   : > { %1242 = vmatmul.msk.bf16.gmra.mxu3 %vm474_vm0, %v1277_v36 }
  0x69   : > { %v427_v38 = vpop.permute.xlu2 %426 }
  0x71   : > { %v432_v43 = vpop.permute.xlu2 %431 }
  0x7f   : > { %v548_v37 = vpop.permute.xlu0 %547  ;;  %v538_v42 = vpop.permute.xlu1 %537 }
  0x87   : > { %v553_v41 = vpop.permute.xlu0 %552  ;;  %v543_v59 = vpop.permute.xlu1 %542 }
  0x8f   : > { %v437_v58 = vpop.permute.xlu0 %436  ;;  %v442_v29 = vpop.permute.xlu1 %441 }
  0x96   : > { %v490_v39 = vpop.f32.mrf.mxu0  ;;  %v509_v40 = vpop.f32.mrf.mxu1 }
  0x97   : > { %v1497_v16 = vadd.f32 %v490_v39, %v427_v38  ;;  %v1499_v17 = vadd.f32 %v509_v40, %v427_v38  ;;  %v833_v38 = vld [vmem:[%s1718_s8] sm:$0xff]  ;;  %v836_v39 = vld [vmem:[%s1718_s8 + $0x18] sm:$0xff]  ;;  %v835_v40 = vld [vmem:[%s1718_s8 + $0x10] sm:$0xff] }
  0x99   : > { %v689_v22 = vmul.f32 %v1497_v16, %v1497_v16  ;;  %v690_v23 = vmul.f32 %v1499_v17, %v1499_v17 }
  0x9b   : > { %v697_v33 = vadd.f32 %v690_v23, %v689_v22 }
  0x9d   : > { %v636_v44 = vpop.f32.mrf.mxu2 }
  0x9e   : > { %v1457_v45 = vadd.f32 %v636_v44, %v538_v42  ;;  %v665_v46 = vpop.f32.mrf.mxu3  ;;  %v492_v47 = vpop.f32.mrf.mxu0 }
  0x9f   : > { %v1459_v48 = vadd.f32 %v665_v46, %v538_v42  ;;  %v1461_v49 = vadd.f32 %v492_v47, %v432_v43  ;;  %v511_v50 = vpop.f32.mrf.mxu1 }
  0xa0   : > { %v761_v51 = vmul.f32 %v1457_v45, %v1457_v45  ;;  %v1465_v52 = vadd.f32 %v511_v50, %v432_v43 }
  0xa1   : > { %v762_v53 = vmul.f32 %v1459_v48, %v1459_v48  ;;  %v691_v54 = vmul.f32 %v1461_v49, %v1461_v49 }
  0xa2   : > { %v692_v55 = vmul.f32 %v1465_v52, %v1465_v52 }
  0xa3   : > { %v769_v56 = vadd.f32 %v762_v53, %v761_v51 }
  0xa4   : > { %v700_v57 = vadd.f32 %v692_v55, %v691_v54 }
  0xa5   : > { %770 = vadd.xlane.f32.xlu1 %v769_v56  ;;  %v638_v60 = vpop.f32.mrf.mxu2 }
  0xa6   : > { %v1473_v61 = vadd.f32 %v638_v60, %v543_v59  ;;  %v667_v62 = vpop.f32.mrf.mxu3  ;;  %701 = vadd.xlane.f32.xlu0 %v700_v57  ;;  %v495_v63 = vpop.f32.mrf.mxu0 }
  0xa7   : > { %v1475_v0 = vadd.f32 %v667_v62, %v543_v59  ;;  %v1477_v1 = vadd.f32 %v495_v63, %v437_v58  ;;  %v514_v2 = vpop.f32.mrf.mxu1 }
  0xa8   : > { %v763_v3 = vmul.f32 %v1473_v61, %v1473_v61  ;;  %v1481_v4 = vadd.f32 %v514_v2, %v437_v58 }
  0xa9   : > { %v764_v5 = vmul.f32 %v1475_v0, %v1475_v0  ;;  %v693_v6 = vmul.f32 %v1477_v1, %v1477_v1 }
  0xaa   : > { %v694_v7 = vmul.f32 %v1481_v4, %v1481_v4 }
  0xab   : > { %v772_v8 = vadd.f32 %v764_v5, %v763_v3 }
  0xac   : > { %v703_v9 = vadd.f32 %v694_v7, %v693_v6 }
  0xad   : > { %773 = vadd.xlane.f32.xlu2 %v772_v8  ;;  %v641_v10 = vpop.f32.mrf.mxu2 }
  0xae   : > { %v1489_v11 = vadd.f32 %v641_v10, %v548_v37  ;;  %v670_v12 = vpop.f32.mrf.mxu3  ;;  %704 = vadd.xlane.f32.xlu1 %v703_v9  ;;  %v497_v25 = vpop.f32.mrf.mxu0 }
  0xaf   : > { %v1491_v13 = vadd.f32 %v670_v12, %v548_v37  ;;  %v516_v26 = vpop.f32.mrf.mxu1  ;;  %v1513_v30 = vadd.f32 %v497_v25, %v442_v29  ;;  %v834_v37 = vld [vmem:[%s1718_s8 + $0x8] sm:$0xff] }
  0xb0   : > { %v765_v14 = vmul.f32 %v1489_v11, %v1489_v11  ;;  %v1515_v31 = vadd.f32 %v516_v26, %v442_v29 }
  0xb1   : > { %v766_v15 = vmul.f32 %v1491_v13, %v1491_v13  ;;  %v695_v34 = vmul.f32 %v1513_v30, %v1513_v30 }
  0xb2   : > { %v696_v35 = vmul.f32 %v1515_v31, %v1515_v31 }
  0xb3   : > { %v775_v18 = vadd.f32 %v766_v15, %v765_v14 }
  0xb4   : > { %v706_v36 = vadd.f32 %v696_v35, %v695_v34 }
  0xb5   : > { %776 = vadd.xlane.f32.xlu2 %v775_v18  ;;  %v643_v19 = vpop.f32.mrf.mxu2 }
  0xb6   : > { %v1501_v20 = vadd.f32 %v643_v19, %v553_v41  ;;  %v672_v21 = vpop.f32.mrf.mxu3 }
  0xb7   : > { %v1507_v24 = vadd.f32 %v672_v21, %v553_v41 }
  0xb8   : > { %v767_v27 = vmul.f32 %v1501_v20, %v1501_v20 }
  0xb9   : > { %v768_v28 = vmul.f32 %v1507_v24, %v1507_v24 }
  0xbb   : > { %v778_v32 = vadd.f32 %v768_v28, %v767_v27 }
  0xbd   : > { %779 = vadd.xlane.f32.xlu0 %v778_v32  ;;  %698 = vadd.xlane.f32.xlu2 %v697_v33 }
  0xc5   : > { %707 = vadd.xlane.f32.xlu2 %v706_v36 }
  0xc7   : > { %844 = vperm.xlu1 %1292, %v834_v37  }
  0xd1   : > { %839 = vperm.xlu0 %1291, %v833_v38  }
  0xd9   : > { %854 = vperm.xlu0 %1291, %v836_v39  }
  0xdd   : > { %849 = vperm.xlu2 %1293, %v835_v40  }
 0x118   : > { %v771_v42 = vpop.xlane.xlu1 %770 }
 0x119   : > { %v1535_v44 = vmax.f32 %v771_v42, 1e-24  ;;  %v702_v46 = vpop.xlane.xlu0 %701 }
 0x11a   : > { %v1539_v51 = vmax.f32 %v702_v46, 1e-24 }
 0x11b   : > { %vm791_vm12 = vweird.f32 %v1535_v44 }
 0x11c   : > { %vm729_vm14 = vweird.f32 %v1539_v51 }
 0x120   : > { %v774_v41 = vpop.xlane.xlu2 %773 }
 0x121   : > { %v1533_v43 = vmax.f32 %v774_v41, 1e-24  ;;  %v705_v14 = vpop.xlane.xlu1 %704 }
 0x122   : > { %v1566_v27 = vmax.f32 %v705_v14, 1e-24 }
 0x123   : > { %1294 = vrsqrt.f32 %v1533_v43  ;;  %vm801_vm9 = vweird.f32 %v1533_v43 }
 0x128   : > { %v777_v47 = vpop.xlane.xlu2 %776 }
 0x129   : > { %v783_v50 = vmax.f32 %v777_v47, 1e-24  ;;  %v1541_v53 = vpop.eup %1294 }
 0x12a   : > { %v796_v62 = vmul.f32 %v1541_v53, %v1533_v43  ;;  %vm802_vm8 = vweird.f32 %v1541_v53 }
 0x12b   : > { %1296 = vrsqrt.f32 %v783_v50  ;;  %vm811_vm2 = vweird.f32 %v783_v50  ;;  %vm803_vm11 = vmor %vm801_vm9, %vm802_vm8 }
 0x12c   : > { %1298 = vrsqrt.f32 %v1535_v44  ;;  %v797_v6 = vmul.f32 %v1541_v53, %v796_v62 }
 0x12d   : > { %1300 = vrsqrt.f32 %v1539_v51 }
 0x12e   : > { %v798_v22 = vmul.f32 0.5, %v797_v6 }
 0x130   : > { %v780_v54 = vpop.xlane.xlu0 %779  ;;  %v699_v55 = vpop.xlane.xlu2 %698  ;;  %v799_v34 = vsub.f32 1.5, %v798_v22 }
 0x131   : > { %v1297_v56 = vpop.eup %1296  ;;  %v784_v57 = vmax.f32 %v780_v54, 1e-24  ;;  %v1544_v58 = vmax.f32 %v699_v55, 1e-24 }
 0x132   : > { %v1546_v59 = vpop.eup %1298  ;;  %v806_v60 = vmul.f32 %v1297_v56, %v783_v50  ;;  %vm812_vm1 = vweird.f32 %v1297_v56  ;;  %v800_v46 = vmul.f32 %v1541_v53, %v799_v34 }
 0x133   : > { %1302 = vrsqrt.f32 %v784_v57  ;;  %v786_v2 = vmul.f32 %v1546_v59, %v1535_v44  ;;  %v1553_v3 = vpop.eup %1300  ;;  %vm813_vm4 = vmor %vm811_vm2, %vm812_vm1  ;;  %vm821_vm5 = vweird.f32 %v784_v57  ;;  %vm792_vm7 = vweird.f32 %v1546_v59 }
 0x134   : > { %v807_v63 = vmul.f32 %v1297_v56, %v806_v60  ;;  %1304 = vrsqrt.f32 %v1544_v58  ;;  %v724_v10 = vmul.f32 %v1553_v3, %v1539_v51  ;;  %vm793_vm13 = vmor %vm791_vm12, %vm792_vm7  ;;  %vm719_vm15 = vweird.f32 %v1544_v58 }
 0x135   : > { %v787_v9 = vmul.f32 %v1546_v59, %v786_v2  ;;  %vm730_vm1 = vweird.f32 %v1553_v3  ;;  %vm739_vm7 = vweird.f32 %v1566_v27 }
 0x136   : > { %v808_v5 = vmul.f32 0.5, %v807_v63  ;;  %v725_v26 = vmul.f32 %v1553_v3, %v724_v10 }
 0x137   : > { %v788_v25 = vmul.f32 0.5, %v787_v9 }
 0x138   : > { %v708_v7 = vpop.xlane.xlu2 %707  ;;  %v809_v15 = vsub.f32 1.5, %v808_v5  ;;  %v726_v36 = vmul.f32 0.5, %v725_v26 }
 0x139   : > { %v1303_v8 = vpop.eup %1302  ;;  %v1561_v19 = vmax.f32 %v708_v7, 1e-24  ;;  %v789_v37 = vsub.f32 1.5, %v788_v25 }
 0x13a   : > { %v1559_v12 = vpop.eup %1304  ;;  %v816_v18 = vmul.f32 %v1303_v8, %v784_v57  ;;  %v810_v32 = vmul.f32 %v1297_v56, %v809_v15  ;;  %vm822_vm3 = vweird.f32 %v1303_v8 }
 0x13b   : > { %v714_v21 = vmul.f32 %v1559_v12, %v1544_v58  ;;  %1306 = vrsqrt.f32 %v1561_v19  ;;  %vm823_vm6 = vmor %vm821_vm5, %vm822_vm3  ;;  %vm720_vm10 = vweird.f32 %v1559_v12  ;;  %v790_v57 = vmul.f32 %v1546_v59, %v789_v37 }
 0x13c   : > { %v817_v23 = vmul.f32 %v1303_v8, %v816_v18  ;;  %1308 = vrsqrt.f32 %v1566_v27  ;;  %v814_v38 = vsel %vm813_vm4, %v1297_v56, %v810_v32  ;;  %v727_v56 = vsub.f32 1.5, %v726_v36  ;;  %vm721_vm2 = vmor %vm719_vm15, %vm720_vm10  ;;  %v845_v18 = vpop.permute.xlu1 %844 }
 0x13d   : > { %v715_v28 = vmul.f32 %v1559_v12, %v714_v21  ;;  %v829_v47 = vmul.f32 %v814_v38, %v1489_v11  ;;  %v830_v54 = vmul.f32 %v814_v38, %v1491_v13  ;;  %v804_v13 = vsel %vm803_vm11, %v1541_v53, %v800_v46  ;;  %vm731_vm3 = vmor %vm729_vm14, %vm730_vm1 }
 0x13e   : > { %v818_v29 = vmul.f32 0.5, %v817_v23  ;;  %v728_v44 = vmul.f32 %v1553_v3, %v727_v56  ;;  %v794_v53 = vsel %vm793_vm13, %v1546_v59, %v790_v57  ;;  %v827_v5 = vmul.f32 %v804_v13, %v1473_v61 }
 0x13f   : > { %v716_v33 = vmul.f32 0.5, %v715_v28  ;;  %v828_v6 = vmul.f32 %v804_v13, %v1475_v0  ;;  %v825_v7 = vmul.f32 %v794_v53, %v1457_v45  ;;  %vm749_vm5 = vweird.f32 %v1561_v19 }
 0x140   : > { %v819_v35 = vsub.f32 1.5, %v818_v29  ;;  %v850_v34 = vpop.permute.xlu2 %849 }
 0x141   : > { %v717_v40 = vsub.f32 1.5, %v716_v33  ;;  %v1571_v41 = vpop.eup %1306  ;;  %v869_v15 = vpack.c.bf16 %v827_v5, %v825_v7  ;;  %v533_v7 = vld [vmem:[%s1716_s6 + $0x30] sm:$0xff] }
 0x142   : > { %v820_v39 = vmul.f32 %v1303_v8, %v819_v35  ;;  %v1583_v60 = vpop.eup %1308  ;;  %v744_v62 = vmul.f32 %v1571_v41, %v1561_v19  ;;  %vm750_vm4 = vweird.f32 %v1571_v41 }
 0x143   : > { %v718_v11 = vmul.f32 %v1559_v12, %v717_v40  ;;  %v734_v43 = vmul.f32 %v1583_v60, %v1566_v27  ;;  %v840_v0 = vpop.permute.xlu0 %839  ;;  %vm740_vm8 = vweird.f32 %v1583_v60 }
 0x144   : > { %v824_v42 = vsel %vm823_vm6, %v1303_v8, %v820_v39  ;;  %v745_v58 = vmul.f32 %v1571_v41, %v744_v62  ;;  %v826_v8 = vmul.f32 %v794_v53, %v1459_v48  ;;  %vm751_vm6 = vmor %vm749_vm5, %vm750_vm4  ;;  %v875_v62 = vld [vmem:[%s1719_s9 + $0x10] sm:$0xff] }
 0x145   : > { %v831_v50 = vmul.f32 %v824_v42, %v1501_v20  ;;  %v832_v55 = vmul.f32 %v824_v42, %v1507_v24  ;;  %v1278_v24 = vld [vmem:[%s1713_s3 + $0x10] sm:$0xff]  ;;  %v722_v2 = vsel %vm721_vm2, %v1559_v12, %v718_v11  ;;  %v735_v59 = vmul.f32 %v1583_v60, %v734_v43  ;;  %vm741_vm9 = vmor %vm739_vm7, %vm740_vm8  ;;  %v876_v43 = vld [vmem:[%s1719_s9 + $0x18] sm:$0xff] }
 0x146   : > { %1239 = vmatmul.msk.bf16.gmra.mxu2 %vm474_vm0, %v1278_v24  ;;  %1243 = vmatmul.msk.bf16.gmra.mxu3 %vm474_vm0, %v1278_v24  ;;  %v753_v9 = vmul.f32 %v722_v2, %v1497_v16  ;;  %v754_v10 = vmul.f32 %v722_v2, %v1499_v17  ;;  %v746_v14 = vmul.f32 0.5, %v745_v58  ;;  %v732_v12 = vsel %vm731_vm3, %v1553_v3, %v728_v44 }
 0x147   : > { %v871_v20 = vpack.c.bf16 %v831_v50, %v829_v47  ;;  %v872_v63 = vpack.c.bf16 %v832_v55, %v830_v54  ;;  %v870_v61 = vpack.c.bf16 %v828_v6, %v826_v8  ;;  %v755_v45 = vmul.f32 %v732_v12, %v1461_v49  ;;  %v874_v50 = vld [vmem:[%s1719_s9 + $0x8] sm:$0xff]  ;;  %v534_v6 = vld [vmem:[%s1716_s6 + $0x38] sm:$0xff] }
 0x148   : > { %v756_v48 = vmul.f32 %v732_v12, %v1465_v52  ;;  %v857_v51 = vmul.f32 %v840_v0, %v753_v9  ;;  %v858_v21 = vmul.f32 %v840_v0, %v754_v10  ;;  %v736_v22 = vmul.f32 0.5, %v735_v59 }
 0x149   : > { %883 = vmatpush.bf16.xpose.msrb.mxu0 %v871_v20  ;;  %902 = vmatpush.bf16.xpose.msrb.mxu1 %v872_v63  ;;  %v747_v23 = vsub.f32 1.5, %v746_v14  ;;  %v859_v16 = vmul.f32 %v845_v18, %v755_v45 }
 0x14a   : > { %v860_v25 = vmul.f32 %v845_v18, %v756_v48  ;;  %v737_v28 = vsub.f32 1.5, %v736_v22 }
 0x14b   : > { %v865_v17 = vpack.c.bf16 %v859_v16, %v857_v51  ;;  %v748_v3 = vmul.f32 %v1571_v41, %v747_v23  ;;  %v855_v35 = vpop.permute.xlu0 %854 }
 0x14c   : > { %v866_v26 = vpack.c.bf16 %v860_v25, %v858_v21  ;;  %v738_v49 = vmul.f32 %v1583_v60, %v737_v28 }
 0x14d   : > { %v752_v52 = vsel %vm751_vm6, %v1571_v41, %v748_v3 }
 0x14e   : > { %v759_v29 = vmul.f32 %v752_v52, %v1513_v30  ;;  %v760_v32 = vmul.f32 %v752_v52, %v1515_v31  ;;  %v742_v33 = vsel %vm741_vm9, %v1583_v60, %v738_v49  ;;  %v1279_v30 = vld [vmem:[%s1713_s3 + $0x18] sm:$0xff]  ;;  %v1013_v49 = vld [vmem:[%s1717_s7] sm:$0xff] }
 0x14f   : > { %v757_v19 = vmul.f32 %v742_v33, %v1477_v1  ;;  %v758_v36 = vmul.f32 %v742_v33, %v1481_v4  ;;  %v873_v1 = vld [vmem:[%s1719_s9] sm:$0xff] }
 0x150   : > { %v863_v27 = vmul.f32 %v855_v35, %v759_v29  ;;  %v864_v37 = vmul.f32 %v855_v35, %v760_v32  ;;  %v531_v29 = vld [vmem:[%s1716_s6 + $0x20] sm:$0xff]  ;;  %v1014_v35 = vld [vmem:[%s1717_s7 + $0x8] sm:$0xff] }
 0x151   : > { %884 = vmatpush.bf16.xpose.msrb.mxu0 %v869_v15  ;;  %903 = vmatpush.bf16.xpose.msrb.mxu1 %v870_v61  ;;  %v861_v38 = vmul.f32 %v850_v34, %v757_v19  ;;  %v862_v39 = vmul.f32 %v850_v34, %v758_v36 }
 0x153   : > { %v867_v40 = vpack.c.bf16 %v863_v27, %v861_v38  ;;  %v868_v42 = vpack.c.bf16 %v864_v37, %v862_v39 }
 0x156   : > { %1240 = vmatmul.msk.bf16.gmra.mxu2 %vm474_vm0, %v1279_v30  ;;  %1244 = vmatmul.msk.bf16.gmra.mxu3 %vm474_vm0, %v1279_v30  ;;  %v1016_v30 = vld [vmem:[%s1717_s7 + $0x18] sm:$0xff] }
 0x158   : > { %885 = vmatmul.bf16.vlgmr.msrb.gmra.mxu0 %v865_v17  ;;  %904 = vmatmul.bf16.vlgmr.msrb.gmra.mxu1 %v866_v26  ;;  %v532_v26 = vld [vmem:[%s1716_s6 + $0x28] sm:$0xff] }
 0x168   : > { %890 = vmatmul.bf16.gmra.mxu0 %v867_v40  ;;  %909 = vmatmul.bf16.gmra.mxu1 %v868_v42  ;;  %v1015_v42 = vld [vmem:[%s1717_s7 + $0x10] sm:$0xff] }
 0x1c9   : > { %v646_v18 = vpop.f32.mrf.mxu2  ;;  %v675_v0 = vpop.f32.mrf.mxu3 }
 0x1d1   : > { %v648_v23 = vpop.f32.mrf.mxu2  ;;  %v677_v16 = vpop.f32.mrf.mxu3 }
 0x1d5   : > { %v886_v4 = vpop.f32.mrf.mxu0  ;;  %v905_v31 = vpop.f32.mrf.mxu1 }
 0x1d6   : > { %v887_v41 = vadd.f32 %v886_v4, %v873_v1 }
 0x1d8   : > { %v906_v46 = vadd.f32 %v905_v31, %v887_v41 }
 0x1d9   : > { %v651_v28 = vpop.f32.mrf.mxu2  ;;  %v680_v3 = vpop.f32.mrf.mxu3 }
 0x1da   : > { %v915_v47 = vsel %vm474_vm0, %v906_v46, -inf }
 0x1db   : > { %916 = vmax.xlane.f32.xlu1 %v915_v47 }
 0x1dd   : > { %v888_v54 = vpop.f32.mrf.mxu0  ;;  %v907_v55 = vpop.f32.mrf.mxu1 }
 0x1de   : > { %v889_v56 = vadd.f32 %v888_v54, %v874_v50 }
 0x1e0   : > { %v908_v57 = vadd.f32 %v907_v55, %v889_v56 }
 0x1e1   : > { %v653_v32 = vpop.f32.mrf.mxu2  ;;  %v682_v33 = vpop.f32.mrf.mxu3 }
 0x1e2   : > { %v918_v60 = vsel %vm474_vm0, %v908_v57, -inf }
 0x1e3   : > { %919 = vmax.xlane.f32.xlu0 %v918_v60 }
 0x1e5   : > { %v891_v11 = vpop.f32.mrf.mxu0  ;;  %v910_v20 = vpop.f32.mrf.mxu1 }
 0x1e6   : > { %v892_v63 = vadd.f32 %v891_v11, %v875_v62 }
 0x1e8   : > { %v911_v13 = vadd.f32 %v910_v20, %v892_v63 }
 0x1ea   : > { %v921_v24 = vsel %vm474_vm0, %v911_v13, -inf }
 0x1eb   : > { %922 = vmax.xlane.f32.xlu2 %v921_v24 }
 0x1ed   : > { %v893_v44 = vpop.f32.mrf.mxu0  ;;  %v912_v58 = vpop.f32.mrf.mxu1 }
 0x1ee   : > { %v894_v53 = vadd.f32 %v893_v44, %v876_v43 }
 0x1f0   : > { %v913_v2 = vadd.f32 %v912_v58, %v894_v53 }
 0x1f2   : > { %v924_v5 = vsel %vm474_vm0, %v913_v2, -inf }
 0x1f3   : > { %925 = vmax.xlane.f32.xlu1 %v924_v5 }
 0x1f7   : > { %572 = vperm.xlu0 %1291, %v534_v6  }
 0x20c   : > { %567 = vperm.xlu1 %1292, %v533_v7  }
 0x24e   : > { %v917_v8 = vpop.xlane.xlu1 %916 }
 0x24f   : > { %v927_v59 = vsub.f32 %v906_v46, %v917_v8 }
 0x251   : > { %v931_v9 = vmul.f32 1.442695, %v927_v59 }
 0x253   : > { %1310 = vpow2.f32 %v931_v9 }
 0x256   : > { %v920_v10 = vpop.xlane.xlu0 %919 }
 0x257   : > { %v928_v14 = vsub.f32 %v908_v57, %v920_v10 }
 0x259   : > { %v1659_v12 = vpop.eup %1310  ;;  %v933_v15 = vmul.f32 1.442695, %v928_v14 }
 0x25a   : > { %v939_v61 = vsel %vm474_vm0, %v1659_v12, 0.0 }
 0x25b   : > { %1312 = vpow2.f32 %v933_v15  ;;  %940 = vadd.xlane.f32.xlu0 %v939_v61 }
 0x25e   : > { %v923_v45 = vpop.xlane.xlu2 %922 }
 0x25f   : > { %v929_v48 = vsub.f32 %v911_v13, %v923_v45 }
 0x261   : > { %v1313_v51 = vpop.eup %1312  ;;  %v935_v21 = vmul.f32 1.442695, %v929_v48 }
 0x262   : > { %v942_v22 = vsel %vm474_vm0, %v1313_v51, 0.0 }
 0x263   : > { %1314 = vpow2.f32 %v935_v21  ;;  %943 = vadd.xlane.f32.xlu2 %v942_v22  ;;  %v1281_v21 = vld [vmem:[%s1714_s4 + $0x8] sm:$0xff] }
 0x266   : > { %v926_v52 = vpop.xlane.xlu1 %925 }
 0x267   : > { %v930_v1 = vsub.f32 %v913_v2, %v926_v52 }
 0x269   : > { %v1664_v25 = vpop.eup %1314  ;;  %v573_v34 = vpop.permute.xlu0 %572  ;;  %v937_v4 = vmul.f32 1.442695, %v930_v1 }
 0x26a   : > { %v945_v17 = vsel %vm474_vm0, %v1664_v25, 0.0  ;;  %v654_v36 = vadd.f32 %v653_v32, %v573_v34  ;;  %v683_v27 = vadd.f32 %v682_v33, %v573_v34 }
 0x26b   : > { %946 = vadd.xlane.f32.xlu1 %v945_v17  ;;  %1316 = vpow2.f32 %v937_v4 }
 0x26f   : > { %562 = vperm.xlu0 %1291, %v532_v26  }
 0x271   : > { %v1317_v31 = vpop.eup %1316 }
 0x272   : > { %v948_v41 = vsel %vm474_vm0, %v1317_v31, 0.0 }
 0x277   : > { %1019 = vperm.xlu0 %1291, %v1013_v49  }
 0x27b   : > { %557 = vperm.xlu2 %1293, %v531_v29  }
 0x27e   : > { %v568_v19 = vpop.permute.xlu1 %567 }
 0x27f   : > { %v652_v37 = vadd.f32 %v651_v28, %v568_v19  ;;  %v681_v38 = vadd.f32 %v680_v3, %v568_v19  ;;  %1024 = vperm.xlu0 %1291, %v1014_v35  }
 0x281   : > { %v687_v39 = vpack.c.bf16 %v654_v36, %v652_v37  ;;  %v688_v40 = vpack.c.bf16 %v683_v27, %v681_v38 }
 0x283   : > { %973 = vmatpush.bf16.msra.mxu0 %v687_v39  ;;  %992 = vmatpush.bf16.msra.mxu1 %v688_v40 }
 0x287   : > { %1029 = vperm.xlu0 %1291, %v1015_v42  }
 0x28f   : > { %1034 = vperm.xlu0 %1291, %v1016_v30  }
 0x2a4   : > { %949 = vadd.xlane.f32.xlu2 %v948_v41 }
 0x2ce   : > { %v941_v47 = vpop.xlane.xlu0 %940 }
 0x2d6   : > { %v944_v46 = vpop.xlane.xlu2 %943 }
 0x2d7   : > { %1318 = vrcp.f32 %v944_v46 }
 0x2d8   : > { %1320 = vrcp.f32 %v941_v47 }
 0x2dd   : > { %v1319_v54 = vpop.eup %1318 }
 0x2de   : > { %v558_v50 = vpop.permute.xlu2 %557  ;;  %v1321_v56 = vpop.eup %1320  ;;  %v956_v20 = vmul.f32 %v1319_v54, %v1313_v51  ;;  %v1280_v51 = vld [vmem:[%s1714_s4] sm:$0xff] }
 0x2df   : > { %v647_v57 = vadd.f32 %v646_v18, %v558_v50  ;;  %v676_v60 = vadd.f32 %v675_v0, %v558_v50  ;;  %v955_v24 = vmul.f32 %v1321_v56, %v1659_v12  ;;  %v947_v44 = vpop.xlane.xlu1 %946 }
 0x2e0   : > { %1322 = vrcp.f32 %v947_v44 }
 0x2e1   : > { %v563_v55 = vpop.permute.xlu0 %562  ;;  %v959_v43 = vpack.c.bf16 %v956_v20, %v955_v24 }
 0x2e2   : > { %v649_v62 = vadd.f32 %v648_v23, %v563_v55  ;;  %v678_v11 = vadd.f32 %v677_v16, %v563_v55 }
 0x2e4   : > { %v685_v63 = vpack.c.bf16 %v649_v62, %v647_v57  ;;  %v686_v13 = vpack.c.bf16 %v678_v11, %v676_v60 }
 0x2e6   : > { %974 = vmatpush.bf16.msra.mxu0 %v685_v63  ;;  %993 = vmatpush.bf16.msra.mxu1 %v686_v13  ;;  %v1323_v58 = vpop.eup %1322 }
 0x2e7   : > { %v957_v5 = vmul.f32 %v1323_v58, %v1664_v25 }
 0x2e9   : > { %1245 = vmatmul.msk.bf16.vlgmr.msra.gmra.mxu0 %vm474_vm0, %v959_v43  ;;  %1247 = vmatmul.msk.bf16.vlgmr.msra.gmra.mxu1 %vm474_vm0, %v959_v43  ;;  %v1020_v22 = vpop.permute.xlu0 %1019 }
 0x2f1   : > { %v1025_v26 = vpop.permute.xlu0 %1024 }
 0x2f9   : > { %v1030_v33 = vpop.permute.xlu0 %1029 }
 0x301   : > { %v1035_v37 = vpop.permute.xlu0 %1034 }
 0x317   : > { %v950_v53 = vpop.xlane.xlu2 %949 }
 0x318   : > { %1324 = vrcp.f32 %v950_v53 }
 0x31e   : > { %v1325_v2 = vpop.eup %1324 }
 0x31f   : > { %v958_v6 = vmul.f32 %v1325_v2, %v1317_v31 }
 0x321   : > { %v960_v7 = vpack.c.bf16 %v958_v6, %v957_v5 }
 0x323   : > { %1246 = vmatmul.msk.bf16.gmra.mxu0 %vm474_vm0, %v960_v7  ;;  %1248 = vmatmul.msk.bf16.gmra.mxu1 %vm474_vm0, %v960_v7 }
 0x366   : > { %v976_v8 = vpop.f32.mrf.mxu0  ;;  %v995_v59 = vpop.f32.mrf.mxu1 }
 0x36e   : > { %v978_v9 = vpop.f32.mrf.mxu0  ;;  %v997_v10 = vpop.f32.mrf.mxu1 }
 0x36f   : > { %v1005_v45 = vpack.c.bf16 %v978_v9, %v976_v8  ;;  %v1006_v48 = vpack.c.bf16 %v997_v10, %v995_v59 }
 0x3a0   : > { %v981_v14 = vpop.f32.mrf.mxu0  ;;  %v1000_v12 = vpop.f32.mrf.mxu1 }
 0x3a8   : > { %v983_v15 = vpop.f32.mrf.mxu0  ;;  %v1002_v61 = vpop.f32.mrf.mxu1 }
 0x3a9   : > { %v1007_v18 = vpack.c.bf16 %v983_v15, %v981_v14  ;;  %v1008_v0 = vpack.c.bf16 %v1002_v61, %v1000_v12 }
 0x3ab   : > { %1059 = vmatpush.bf16.msrb.mxu2 %v1007_v18  ;;  %1078 = vmatpush.bf16.msrb.mxu3 %v1008_v0 }
 0x3af   : > { %1060 = vmatpush.bf16.msrb.mxu2 %v1005_v45  ;;  %1079 = vmatpush.bf16.msrb.mxu3 %v1006_v48 }
 0x3b2   : > { %1257 = vmatmul.msk.bf16.vlgmr.msrb.gmra.mxu2 %vm474_vm0, %v1280_v51  ;;  %1259 = vmatmul.msk.bf16.vlgmr.msrb.gmra.mxu3 %vm474_vm0, %v1280_v51 }
 0x3c2   : > { %1258 = vmatmul.msk.bf16.gmra.mxu2 %vm474_vm0, %v1281_v21  ;;  %1260 = vmatmul.msk.bf16.gmra.mxu3 %vm474_vm0, %v1281_v21 }
 0x435   : > { %v1062_v23 = vpop.f32.mrf.mxu2  ;;  %v1081_v16 = vpop.f32.mrf.mxu3 }
 0x436   : > { %v1063_v25 = vadd.f32 %v1062_v23, %v1020_v22  ;;  %v1082_v17 = vadd.f32 %v1081_v16, %v1020_v22 }
 0x438   : > { %v1091_v28 = vpack.c.bf16 %v1082_v17, %v1063_v25 }
 0x43a   : > { %1095 = vst [vmem:[%s406_s10] sm:$0xff] %v1091_v28 }
 0x43d   : > { %v1064_v3 = vpop.f32.mrf.mxu2  ;;  %v1083_v49 = vpop.f32.mrf.mxu3 }
 0x43e   : > { %v1065_v52 = vadd.f32 %v1064_v3, %v1025_v26  ;;  %v1084_v29 = vadd.f32 %v1083_v49, %v1025_v26 }
 0x440   : > { %v1092_v32 = vpack.c.bf16 %v1084_v29, %v1065_v52 }
 0x442   : > { %1096 = vst [vmem:[%s406_s10 + $0x8] sm:$0xff] %v1092_v32 }
 0x445   : > { %v1067_v34 = vpop.f32.mrf.mxu2  ;;  %v1086_v35 = vpop.f32.mrf.mxu3 }
 0x446   : > { %v1068_v19 = vadd.f32 %v1067_v34, %v1030_v33  ;;  %v1087_v36 = vadd.f32 %v1086_v35, %v1030_v33 }
 0x448   : > { %v1093_v27 = vpack.c.bf16 %v1087_v36, %v1068_v19 }
 0x44a   : > { %1097 = vst [vmem:[%s406_s10 + $0x10] sm:$0xff] %v1093_v27 }
 0x44d   : > { %v1069_v38 = vpop.f32.mrf.mxu2  ;;  %v1088_v39 = vpop.f32.mrf.mxu3 }
 0x44e   : > { %v1070_v40 = vadd.f32 %v1069_v38, %v1035_v37  ;;  %v1089_v42 = vadd.f32 %v1088_v39, %v1035_v37 }
 0x450   : > { %v1094_v30 = vpack.c.bf16 %v1089_v42, %v1070_v40 }
 0x452   : > { %1098 = vst [vmem:[%s406_s10 + $0x18] sm:$0xff] %v1094_v30 }
 0x453 PF: > { %s21_s17 = sadd.s32 1, %s1332_s17  }
 0x454   : > { %p18_p4 = scmp.ge.s32.totalorder %s21_s17, 4  }
 0x456   :  { %20 = sbr.rel (!%p18_p4) target bundleno = 1 (0x1), region = 97 }

</bundles_post_ra>
